<compile_context>
chip_gen: v6e
topology: v6e:2x2x1
jax: 0.10.0
libtpu: 0.0.40
codegen_flags: <defaults>
</compile_context>

<pallas_src>
import functools

import jax
import jax.numpy as jnp
from jax import lax
from jax.experimental import pallas as pl
from jax.experimental.pallas import tpu as pltpu

LANES = 128            # lane width (last dim of every tile)
MAX_BLOCK_ROWS = 4096  # 4096*128*4B = 2 MiB per f32 input buffer (8 MiB dbl-buffered)
VMEM_LIMIT_BYTES = 32 * 1024 * 1024  # headroom over v5e's 16 MiB scoped default


def _accumulate(diff, tmax, acc_ref):
    """Fold a (block_rows, 128) tile into the (8, 128) per-core accumulators."""
    g = diff.shape[0] // 8
    ad = jnp.abs(diff)
    sq = diff * diff
    # (block_rows,128) -> (g,8,128) regroups whole (8,128) vreg tiles; the sum /
    # max over the leading axis is pure full-vreg VALU work (no XLU, no masked
    # sub-vreg stores).
    acc_ref[0, 0] += jnp.sum(ad.reshape(g, 8, LANES), axis=0)
    acc_ref[0, 1] += jnp.sum(sq.reshape(g, 8, LANES), axis=0)
    acc_ref[0, 2] = jnp.maximum(acc_ref[0, 2],
                                jnp.max(tmax.reshape(g, 8, LANES), axis=0))


def _mlh_kernel(o_ref, t_ref, acc_ref, *, block_rows, tiles_per_core, n_tiles,
                last_valid_rows):
    c = pl.program_id(0)   # core ("parallel") axis
    j = pl.program_id(1)   # streaming reduction axis

    @pl.when(j == 0)
    def _init():
        acc_ref[0, 0] = jnp.zeros((8, LANES), jnp.float32)                   # sum |d|
        acc_ref[0, 1] = jnp.zeros((8, LANES), jnp.float32)                   # sum d^2
        acc_ref[0, 2] = jnp.full((8, LANES), -jnp.inf, jnp.float32)          # max t

    # Inputs stream from HBM in their native dtype; cast per tile on the VPU.
    o = o_ref[...].astype(jnp.float32)
    t = t_ref[...].astype(jnp.float32)
    diff = o - t

    if last_valid_rows == block_rows:
        # Every tile is full: single branch-free fast path.
        _accumulate(diff, t, acc_ref)
    else:
        tile_idx = c * tiles_per_core + j

        @pl.when(tile_idx != n_tiles - 1)
        def _fast():
            _accumulate(diff, t, acc_ref)

        @pl.when(tile_idx == n_tiles - 1)
        def _masked():
            # Only the Pallas-padded rows of the final partial tile are masked;
            # mask `diff` once and derive |d| and d^2 from it.
            row_ids = lax.broadcasted_iota(jnp.int32, (block_rows, LANES), 0)
            mask = row_ids < last_valid_rows
            d = jnp.where(mask, diff, 0.0)
            tm = jnp.where(mask, t, -jnp.inf)
            _accumulate(d, tm, acc_ref)


def mlh_loss3(inputs, output, target, *, max_block_rows=MAX_BLOCK_ROWS):
    """Forward pass of MLHLoss3. `inputs` is unused by the PyTorch module."""
    del inputs
    assert max_block_rows % 8 == 0

    o = output.reshape(-1)   # free bitcast view
    t = target.reshape(-1)
    n = o.shape[0]

    rows = n // LANES
    use_kernel = rows >= 8                       # tiny inputs: pure wrapper math
    kernel_elems = rows * LANES if use_kernel else 0

    sum_abs = jnp.float32(0.0)
    sum_sq = jnp.float32(0.0)
    max_t = jnp.float32(-jnp.inf)

    if use_kernel:
        # Zero-copy (rows, 128) view when n is lane-aligned; otherwise stream
        # only the aligned prefix (tail handled below in the wrapper).
        o_main = o if kernel_elems == n else o[:kernel_elems]
        t_main = t if kernel_elems == n else t[:kernel_elems]
        o2 = o_main.reshape(rows, LANES)
        t2 = t_main.reshape(rows, LANES)

        # Tile geometry: big (multiple-of-8) row tiles; an optional 2-way
        # leading "parallel" axis is used only when it splits the tile count
        # exactly (no clamped duplicate DMAs, no extra masking).
        block_rows = min(max_block_rows, (rows // 8) * 8)
        n_tiles = pl.cdiv(rows, block_rows)
        nc = 2 if (n_tiles >= 2 and n_tiles % 2 == 0) else 1
        tiles_per_core = n_tiles // nc
        last_valid_rows = rows - (n_tiles - 1) * block_rows

        def in_map(c, j):
            return (c * tiles_per_core + j, 0)

        kernel = functools.partial(
            _mlh_kernel, block_rows=block_rows, tiles_per_core=tiles_per_core,
            n_tiles=n_tiles, last_valid_rows=last_valid_rows)

        itemsize = jnp.dtype(output.dtype).itemsize
        out_bytes = nc * 3 * 8 * LANES * 4
        partials = pl.pallas_call(
            kernel,
            out_shape=jax.ShapeDtypeStruct((nc, 3, 8, LANES), jnp.float32),
            grid_spec=pltpu.PrefetchScalarGridSpec(
                num_scalar_prefetch=0,
                grid=(nc, tiles_per_core),
                in_specs=[pl.BlockSpec((block_rows, LANES), in_map),
                          pl.BlockSpec((block_rows, LANES), in_map)],
                out_specs=pl.BlockSpec((1, 3, 8, LANES),
                                       lambda c, j: (c, 0, 0, 0)),
            ),
            compiler_params=pltpu.CompilerParams(
                dimension_semantics=("parallel", "arbitrary"),
                vmem_limit_bytes=VMEM_LIMIT_BYTES),
            cost_estimate=pl.CostEstimate(
                flops=8 * kernel_elems,
                transcendentals=0,
                bytes_accessed=2 * kernel_elems * itemsize + out_bytes),
        )(o2, t2)

        sum_abs = jnp.sum(partials[:, 0])
        sum_sq = jnp.sum(partials[:, 1])
        max_t = jnp.max(partials[:, 2])

    if kernel_elems < n:
        # Ragged tail (< 128 elements) or tiny input: plain JAX, negligible cost.
        ot = o[kernel_elems:].astype(jnp.float32)
        tt = t[kernel_elems:].astype(jnp.float32)
        dt = ot - tt
        sum_abs = sum_abs + jnp.sum(jnp.abs(dt))
        sum_sq = sum_sq + jnp.sum(dt * dt)
        max_t = jnp.maximum(max_t, jnp.max(tt))

    n_f = jnp.float32(n)
    mae = sum_abs / n_f
    mse = sum_sq / n_f
    rmse = jnp.sqrt(mse)
    rrms = rmse / max_t
    # NOTE: the PyTorch module also computes weighted_loss, but it never enters
    # the returned loss; it is intentionally omitted (dead code).
    return mae + mse + rmse + rrms


def _reference(output, target):
    o = output.astype(jnp.float32).reshape(-1)
    t = target.astype(jnp.float32).reshape(-1)
    d = o - t
    mae = jnp.mean(jnp.abs(d))
    mse = jnp.mean(d * d)
    rmse = jnp.sqrt(mse)
    return mae + mse + rmse + rmse / jnp.max(t)


if __name__ == "__main__":
    key = jax.random.PRNGKey(0)

    def make_case(k, shape):
        k1, k2, k3 = jax.random.split(k, 3)
        inputs = jax.random.normal(k1, shape, jnp.float32)
        target = jax.random.uniform(k2, shape, jnp.float32, minval=0.5, maxval=1.5)
        output = target + 0.3 * jax.random.normal(k3, shape, jnp.float32)
        return inputs, output, target

    cases = [
        ((2, 4, 16, 16), {}),                          # lane-aligned, single tile, no tail
        ((2, 3, 5, 7), {}),                            # tiny (<8 rows): wrapper-only path
        ((7, 300), {}),                                # ragged tail folded into wrapper
        ((1, 1, 520, 128), dict(max_block_rows=256)),  # 3 tiles, masked partial last tile
        ((8, 128, 128), dict(max_block_rows=256)),     # 4 tiles, exact 2-core split
    ]
    for i, (shape, kw) in enumerate(cases):
        ki = jax.random.fold_in(key, i)
        inputs, output, target = make_case(ki, shape)
        loss = jax.block_until_ready(mlh_loss3(inputs, output, target, **kw))
        ref = jax.block_until_ready(_reference(output, target))
        assert jnp.allclose(loss, ref, rtol=1e-4, atol=1e-5), (shape, loss, ref)

    print("KERNEL_OK")
</pallas_src>

<mosaic_0001>
module attributes {stable_mosaic.version = 11 : i64} {
  func.func @_mlh_kernel(%arg0: i32, %arg1: i32, %arg2: memref<16x128xf32, #tpu.memory_space<vmem>>, %arg3: memref<16x128xf32, #tpu.memory_space<vmem>>, %arg4: memref<1x3x8x128xf32, #tpu.memory_space<vmem>>) attributes {dimension_semantics = [#tpu.dimension_semantics<parallel>, #tpu.dimension_semantics<arbitrary>], iteration_bounds = array<i64: 1, 1>, scalar_prefetch = 0 : i64, scratch_operands = 0 : i64, tpu.core_type = #tpu.core_type<tc>, window_params = [{transform_indices = @transform_0, window_bounds = array<i64: 16, 128>}, {transform_indices = @transform_1, window_bounds = array<i64: 16, 128>}, {transform_indices = @transform_2, window_bounds = array<i64: 1, 3, 8, 128>}]} {
    %c0_i32 = arith.constant 0 : i32
    %0 = arith.cmpi eq, %arg1, %c0_i32 : i32
    %1 = arith.extui %0 : i1 to i32
    %c0_i32_0 = arith.constant 0 : i32
    %2 = arith.cmpi ne, %1, %c0_i32_0 : i32
    scf.if %2 {
      %cst_28 = arith.constant 0.000000e+00 : f32
      %32 = vector.broadcast %cst_28 : f32 to vector<8x128xf32>
      %c0_29 = arith.constant 0 : index
      %c0_30 = arith.constant 0 : index
      %c0_31 = arith.constant 0 : index
      %c0_32 = arith.constant 0 : index
      %33 = vector.load %arg4[%c0_29, %c0_30, %c0_31, %c0_32] : memref<1x3x8x128xf32, #tpu.memory_space<vmem>>, vector<1x1x8x128xf32>
      %34 = vector.shape_cast %33 : vector<1x1x8x128xf32> to vector<8x128xf32>
      %35 = vector.shape_cast %32 : vector<8x128xf32> to vector<1x1x8x128xf32>
      tpu.vector_store %arg4[%c0_29, %c0_30, %c0_31, %c0_32], %35 {strides = array<i32>} : memref<1x3x8x128xf32, #tpu.memory_space<vmem>>, vector<1x1x8x128xf32>,
      %cst_33 = arith.constant 0.000000e+00 : f32
      %36 = vector.broadcast %cst_33 : f32 to vector<8x128xf32>
      %c0_34 = arith.constant 0 : index
      %c1_35 = arith.constant 1 : index
      %c0_36 = arith.constant 0 : index
      %c0_37 = arith.constant 0 : index
      %37 = vector.load %arg4[%c0_34, %c1_35, %c0_36, %c0_37] : memref<1x3x8x128xf32, #tpu.memory_space<vmem>>, vector<1x1x8x128xf32>
      %38 = vector.shape_cast %37 : vector<1x1x8x128xf32> to vector<8x128xf32>
      %39 = vector.shape_cast %36 : vector<8x128xf32> to vector<1x1x8x128xf32>
      tpu.vector_store %arg4[%c0_34, %c1_35, %c0_36, %c0_37], %39 {strides = array<i32>} : memref<1x3x8x128xf32, #tpu.memory_space<vmem>>, vector<1x1x8x128xf32>,
      %cst_38 = arith.constant 0xFF800000 : f32
      %40 = vector.broadcast %cst_38 : f32 to vector<8x128xf32>
      %c0_39 = arith.constant 0 : index
      %c2_40 = arith.constant 2 : index
      %c0_41 = arith.constant 0 : index
      %c0_42 = arith.constant 0 : index
      %41 = vector.load %arg4[%c0_39, %c2_40, %c0_41, %c0_42] : memref<1x3x8x128xf32, #tpu.memory_space<vmem>>, vector<1x1x8x128xf32>
      %42 = vector.shape_cast %41 : vector<1x1x8x128xf32> to vector<8x128xf32>
      %43 = vector.shape_cast %40 : vector<8x128xf32> to vector<1x1x8x128xf32>
      tpu.vector_store %arg4[%c0_39, %c2_40, %c0_41, %c0_42], %43 {strides = array<i32>} : memref<1x3x8x128xf32, #tpu.memory_space<vmem>>, vector<1x1x8x128xf32>,
    } else {
    }
    %c0 = arith.constant 0 : index
    %c0_1 = arith.constant 0 : index
    %3 = vector.load %arg2[%c0, %c0_1] : memref<16x128xf32, #tpu.memory_space<vmem>>, vector<16x128xf32>
    %c0_2 = arith.constant 0 : index
    %c0_3 = arith.constant 0 : index
    %4 = vector.load %arg3[%c0_2, %c0_3] : memref<16x128xf32, #tpu.memory_space<vmem>>, vector<16x128xf32>
    %5 = arith.subf %3, %4 : vector<16x128xf32>
    %6 = math.absf %5 : vector<16x128xf32>
    %7 = arith.mulf %5, %5 : vector<16x128xf32>
    %c0_4 = arith.constant 0 : index
    %c0_5 = arith.constant 0 : index
    %c0_6 = arith.constant 0 : index
    %c0_7 = arith.constant 0 : index
    %8 = vector.load %arg4[%c0_4, %c0_5, %c0_6, %c0_7] : memref<1x3x8x128xf32, #tpu.memory_space<vmem>>, vector<1x1x8x128xf32>
    %9 = vector.shape_cast %8 : vector<1x1x8x128xf32> to vector<8x128xf32>
    %10 = vector.shape_cast %6 : vector<16x128xf32> to vector<2x8x128xf32>
    %cst = arith.constant dense<0.000000e+00> : vector<8x128xf32>
    %11 = vector.multi_reduction <add>, %10, %cst [0] : vector<2x8x128xf32> to vector<8x128xf32>
    %12 = arith.addf %9, %11 : vector<8x128xf32>
    %c0_8 = arith.constant 0 : index
    %c0_9 = arith.constant 0 : index
    %c0_10 = arith.constant 0 : index
    %c0_11 = arith.constant 0 : index
    %13 = vector.load %arg4[%c0_8, %c0_9, %c0_10, %c0_11] : memref<1x3x8x128xf32, #tpu.memory_space<vmem>>, vector<1x1x8x128xf32>
    %14 = vector.shape_cast %13 : vector<1x1x8x128xf32> to vector<8x128xf32>
    %15 = vector.shape_cast %12 : vector<8x128xf32> to vector<1x1x8x128xf32>
    tpu.vector_store %arg4[%c0_8, %c0_9, %c0_10, %c0_11], %15 {strides = array<i32>} : memref<1x3x8x128xf32, #tpu.memory_space<vmem>>, vector<1x1x8x128xf32>,
    %c0_12 = arith.constant 0 : index
    %c1 = arith.constant 1 : index
    %c0_13 = arith.constant 0 : index
    %c0_14 = arith.constant 0 : index
    %16 = vector.load %arg4[%c0_12, %c1, %c0_13, %c0_14] : memref<1x3x8x128xf32, #tpu.memory_space<vmem>>, vector<1x1x8x128xf32>
    %17 = vector.shape_cast %16 : vector<1x1x8x128xf32> to vector<8x128xf32>
    %18 = vector.shape_cast %7 : vector<16x128xf32> to vector<2x8x128xf32>
    %cst_15 = arith.constant dense<0.000000e+00> : vector<8x128xf32>
    %19 = vector.multi_reduction <add>, %18, %cst_15 [0] : vector<2x8x128xf32> to vector<8x128xf32>
    %20 = arith.addf %17, %19 : vector<8x128xf32>
    %c0_16 = arith.constant 0 : index
    %c1_17 = arith.constant 1 : index
    %c0_18 = arith.constant 0 : index
    %c0_19 = arith.constant 0 : index
    %21 = vector.load %arg4[%c0_16, %c1_17, %c0_18, %c0_19] : memref<1x3x8x128xf32, #tpu.memory_space<vmem>>, vector<1x1x8x128xf32>
    %22 = vector.shape_cast %21 : vector<1x1x8x128xf32> to vector<8x128xf32>
    %23 = vector.shape_cast %20 : vector<8x128xf32> to vector<1x1x8x128xf32>
    tpu.vector_store %arg4[%c0_16, %c1_17, %c0_18, %c0_19], %23 {strides = array<i32>} : memref<1x3x8x128xf32, #tpu.memory_space<vmem>>, vector<1x1x8x128xf32>,
    %c0_20 = arith.constant 0 : index
    %c2 = arith.constant 2 : index
    %c0_21 = arith.constant 0 : index
    %c0_22 = arith.constant 0 : index
    %24 = vector.load %arg4[%c0_20, %c2, %c0_21, %c0_22] : memref<1x3x8x128xf32, #tpu.memory_space<vmem>>, vector<1x1x8x128xf32>
    %25 = vector.shape_cast %24 : vector<1x1x8x128xf32> to vector<8x128xf32>
    %26 = vector.shape_cast %4 : vector<16x128xf32> to vector<2x8x128xf32>
    %cst_23 = arith.constant dense<0xFF800000> : vector<8x128xf32>
    %27 = vector.multi_reduction <maximumf>, %26, %cst_23 [0] : vector<2x8x128xf32> to vector<8x128xf32>
    %28 = arith.maximumf %25, %27 : vector<8x128xf32>
    %c0_24 = arith.constant 0 : index
    %c2_25 = arith.constant 2 : index
    %c0_26 = arith.constant 0 : index
    %c0_27 = arith.constant 0 : index
    %29 = vector.load %arg4[%c0_24, %c2_25, %c0_26, %c0_27] : memref<1x3x8x128xf32, #tpu.memory_space<vmem>>, vector<1x1x8x128xf32>
    %30 = vector.shape_cast %29 : vector<1x1x8x128xf32> to vector<8x128xf32>
    %31 = vector.shape_cast %28 : vector<8x128xf32> to vector<1x1x8x128xf32>
    tpu.vector_store %arg4[%c0_24, %c2_25, %c0_26, %c0_27], %31 {strides = array<i32>} : memref<1x3x8x128xf32, #tpu.memory_space<vmem>>, vector<1x1x8x128xf32>,
    return
  }
  func.func @transform_0(%arg0: i32, %arg1: i32) -> (i32, i32) {
    %c1_i32 = arith.constant 1 : i32
    %0 = arith.muli %arg0, %c1_i32 : i32
    %1 = arith.addi %0, %arg1 : i32
    %c0_i32 = arith.constant 0 : i32
    %c0_i32_0 = arith.constant 0 : i32
    return %1, %c0_i32 : i32, i32
  }
  func.func @transform_1(%arg0: i32, %arg1: i32) -> (i32, i32) {
    %c1_i32 = arith.constant 1 : i32
    %0 = arith.muli %arg0, %c1_i32 : i32
    %1 = arith.addi %0, %arg1 : i32
    %c0_i32 = arith.constant 0 : i32
    %c0_i32_0 = arith.constant 0 : i32
    return %1, %c0_i32 : i32, i32
  }
  func.func @transform_2(%arg0: i32, %arg1: i32) -> (i32, i32, i32, i32) {
    %c0_i32 = arith.constant 0 : i32
    %c0_i32_0 = arith.constant 0 : i32
    %c0_i32_1 = arith.constant 0 : i32
    %c0_i32_2 = arith.constant 0 : i32
    return %arg0, %c0_i32, %c0_i32_0, %c0_i32_1 : i32, i32, i32, i32
  }
}

</mosaic_0001>

<bundles_post_ra>
// kernel: tpu_custom_call.1
= control target key start
LH: loop header
LB: loop body
LE: loop exit
PB: predicated region body
PF: predicated region fallthrough
CT: control target
= control target key end

     0   :  { %7 = vsyncpa [#allocation3], 0  ;;  %s214_s0 = inlined_call_operand.hbm [shape: f32[16,128], index: 0, kind: input, shape index: {}]   ;;  %s215_s1 = inlined_call_operand.hbm [shape: f32[16,128], index: 1, kind: input, shape index: {}]   ;;  %s216_s2 = inlined_call_operand.hbm [shape: f32[1,3,8,128], index: 2, kind: output, shape index: {}]  }
   0x1   :  { %8 = vsyncpa [#allocation6], 0 }
   0x2   :  { %9 = vsyncpa [#allocation4], 0  ;;  %s176_s9 = smov [#allocation2]  }
   0x3   :  { %s19_s10 = sshll.u32 %s176_s9, 4  ;;  %s20_s10 = int_to_ptr.vmem [resolvable:$true] %s19_s10 }
   0x4   :  { %s118_s11 = scalar_lea.vmem %s20_s10, 256  ;;  %p123_p1 = scmp.lt.s32.totalorder %s20_s10, %s20_s10 }
   0x5   :  { %p119_p0 = scmp.ne.s32.totalorder %s20_s10, %s118_s11  ;;  %p124_p2 = scmp.lt.s32.totalorder %s118_s11, %s118_s11 }
   0x7   :  { %p125_p3 = por %p124_p2, %p123_p1 }
   0x9   :  { %p126_p4 = pnand %p125_p3, %p119_p0 }
   0xb   :  { %129 = shalt.err (!%p126_p4)
}
   0xc   :  { %s177_s12 = smov 128   ;;  %s178_s13 = smov 8  }
   0xd   :  { %25 = dma.hbm_to_vmem [thread:$0]  %s214_s0, 256, %s20_s10, [#allocation3], %s177_s12, %s177_s12, %s178_s13  }
   0xe   :  { %s179_s16 = smov [#allocation5]  }
   0xf   :  { %s35_s17 = sshll.u32 %s179_s16, 4  ;;  %s36_s17 = int_to_ptr.vmem [resolvable:$true] %s35_s17 }
  0x10   :  { %s138_s18 = scalar_lea.vmem %s36_s17, 256  ;;  %p143_p6 = scmp.lt.s32.totalorder %s36_s17, %s36_s17 }
  0x11   :  { %p139_p5 = scmp.ne.s32.totalorder %s36_s17, %s138_s18  ;;  %p144_p7 = scmp.lt.s32.totalorder %s138_s18, %s138_s18 }
  0x13   :  { %p145_p8 = por %p144_p7, %p143_p6 }
  0x15   :  { %p146_p9 = pnand %p145_p8, %p139_p5 }
  0x17   :  { %149 = shalt.err (!%p146_p9)
}
  0x18   :  { %41 = dma.hbm_to_vmem [thread:$0]  %s215_s1, 256, %s36_s17, [#allocation6], %s177_s12, %s177_s12, %s178_s13  }
  0x19   :  { %170 = dma.done.wait [#allocation3], 256  }
  0x1a   :  { %171 = vsyncadd [#allocation3], 4294967040 }
  0x1b   :  { %172 = dma.done.wait [#allocation6], 256  }
  0x1c   :  { %173 = vsyncadd [#allocation6], 4294967040  ;;  %v61_v0 = vld [vmem:[#allocation2] sm:$0xff]  ;;  %v62_v1 = vld [vmem:[#allocation2 + $0x8] sm:$0xff]  ;;  %s180_s0 = smov [#allocation7]  }
  0x1d   :  { %v63_v2 = vld [vmem:[#allocation5] sm:$0xff]  ;;  %v64_v3 = vld [vmem:[#allocation5 + $0x8] sm:$0xff]  ;;  %s90_s21 = sshll.u32 %s180_s0, 4  ;;  %s91_s21 = int_to_ptr.vmem [resolvable:$true] %s90_s21 }
  0x1e   :  { %v65_v4 = vsub.f32 %v61_v0, %v63_v2  ;;  %v66_v5 = vsub.f32 %v62_v1, %v64_v3  ;;  %v82_v6 = vmax.f32 %v63_v2, %v64_v3  ;;  %s150_s1 = scalar_lea.vmem %s91_s21, 384  ;;  %p155_p11 = scmp.lt.s32.totalorder %s91_s21, %s91_s21 }
  0x1f   :  { %p151_p10 = scmp.ne.s32.totalorder %s91_s21, %s150_s1  ;;  %p156_p12 = scmp.lt.s32.totalorder %s150_s1, %s150_s1 }
  0x20   :  { %v67_v7 = vand.u32 2147483647, %v65_v4  ;;  %v69_v8 = vmul.f32 %v65_v4, %v65_v4  ;;  %v68_v9 = vand.u32 2147483647, %v66_v5  ;;  %v70_v10 = vmul.f32 %v66_v5, %v66_v5  ;;  %84 = vst [vmem:[#allocation7 + $0x10] sm:$0xff] %v82_v6 }
  0x21   :  { %p157_p13 = por %p156_p12, %p155_p11 }
  0x22   :  { %v72_v11 = vadd.f32 %v68_v9, %v67_v7  ;;  %v77_v12 = vadd.f32 %v70_v10, %v69_v8 }
  0x23   :  { %p158_p0 = pnand %p157_p13, %p151_p10 }
  0x24   :  { %74 = vst [vmem:[#allocation7] sm:$0xff] %v72_v11  ;;  %79 = vst [vmem:[#allocation7 + $0x8] sm:$0xff] %v77_v12 }
  0x25   :  { %161 = shalt.err (!%p158_p0)
}
  0x26   :  { %96 = dma.vmem_to_hbm [thread:$0]  %s91_s21, 384, %s216_s2, [#allocation4], %s177_s12, %s177_s12, %s178_s13  }
  0x27   :  { %174 = dma.done.wait [#allocation4], 384  }
  0x28   :  { %175 = vsyncadd [#allocation4], 4294966912 }
  0x29   :  { %100 = vsyncpa [#allocation3], 1 }
  0x2a   :  { %101 = vsyncpa [#allocation6], 1 }
  0x2b   :  { %102 = vsyncpa [#allocation4], 1 }

</bundles_post_ra>
